<compile_context>
chip_gen: v7x
topology: tpu7x:2x2x1
jax: 0.10.0
libtpu: 0.0.40
codegen_flags: <defaults>
</compile_context>

<pallas_src>
import jax
import jax.numpy as jnp
from jax.experimental import pallas as pl
from jax.experimental.pallas import tpu as pltpu

INPUT_SIZE = 28 * 28   # 784
HIDDEN_SIZE = 100
NUM_CLASSES = 10

HIDDEN_PAD = 128       # lane-multiple padding of the hidden dim (zeros -> exact)
CLASSES_PAD = 128      # lane-dense output stores; sliced back to NUM_CLASSES


def _round_up(n, m):
    return (n + m - 1) // m * m


def _mlp_kernel(x_ref, w1_ref, b1_ref, w2_ref, b2_ref, o_ref):
    # Cast x to bf16 in-kernel (VPU), hidden under the input DMA.
    x = x_ref[...].astype(jnp.bfloat16)
    # fc1: (TB, 784)bf16 @ (784, 128)bf16 -> f32 accumulate on the MXU.
    h = jnp.dot(x, w1_ref[...], preferred_element_type=jnp.float32)
    h = jnp.tanh(h + b1_ref[...])            # f32 bias add (VPU) + tanh (EUP)
    # fc2: (TB, 128)bf16 @ (128, 128)bf16 -> f32 accumulate.
    out = jnp.dot(h.astype(jnp.bfloat16), w2_ref[...],
                  preferred_element_type=jnp.float32)
    out = out + b2_ref[...]
    # Lane-dense (TB, 128) store, bf16 to halve the write-back traffic.
    o_ref[...] = out.astype(o_ref.dtype)


def prepare_params(w1, b1, w2, b2):
    """One-time padding + bf16 cast of parameters (hoisted out of the hot path).

    w1: (784, 100), b1: (1, 100) or (100,), w2: (100, 10), b2: (1, 10) or (10,).
    Zero padding is mathematically exact: tanh(0)=0 feeds zero W2 rows and the
    extra output columns are sliced off by the caller.
    """
    w1p = jnp.zeros((INPUT_SIZE, HIDDEN_PAD), jnp.bfloat16)
    w1p = w1p.at[:, :HIDDEN_SIZE].set(w1.astype(jnp.bfloat16))
    b1p = jnp.zeros((1, HIDDEN_PAD), jnp.float32)
    b1p = b1p.at[:, :HIDDEN_SIZE].set(jnp.reshape(b1, (1, HIDDEN_SIZE)))
    w2p = jnp.zeros((HIDDEN_PAD, CLASSES_PAD), jnp.bfloat16)
    w2p = w2p.at[:HIDDEN_SIZE, :NUM_CLASSES].set(w2.astype(jnp.bfloat16))
    b2p = jnp.zeros((1, CLASSES_PAD), jnp.float32)
    b2p = b2p.at[:, :NUM_CLASSES].set(jnp.reshape(b2, (1, NUM_CLASSES)))
    return w1p, b1p, w2p, b2p


def _pick_tile_b(B, tile_b):
    """Pick a batch tile: multiple of 16 (bf16 sublane packing), clamped for
    small B, and guaranteeing >=2 grid steps when B > 16 so the 'parallel'
    batch axis can shard across both TensorCores on v7x."""
    if B > 16:
        tile_b = min(tile_b, _round_up(pl.cdiv(B, 2), 16))
    tile_b = min(tile_b, _round_up(B, 16))
    return max(16, _round_up(tile_b, 16))


def feedforward(x, w1p, b1p, w2p, b2p, *, tile_b=1024):
    """x: (B, INPUT_SIZE) f32.  w1p/b1p/w2p/b2p: padded params from
    prepare_params().  Returns (B, NUM_CLASSES) bf16 logits."""
    B, D = x.shape
    assert D == INPUT_SIZE

    tile_b = _pick_tile_b(B, tile_b)
    Bp = _round_up(B, tile_b)

    xp = x
    if Bp != B:
        xp = jnp.pad(xp, ((0, Bp - B), (0, 0)))   # f32 pad; no wrapper cast

    grid = (Bp // tile_b,)
    out_padded = pl.pallas_call(
        _mlp_kernel,
        out_shape=jax.ShapeDtypeStruct((Bp, CLASSES_PAD), jnp.bfloat16),
        grid_spec=pltpu.PrefetchScalarGridSpec(
            num_scalar_prefetch=0,
            grid=grid,
            in_specs=[
                pl.BlockSpec((tile_b, INPUT_SIZE), lambda i: (i, 0)),        # x tile (f32)
                pl.BlockSpec((INPUT_SIZE, HIDDEN_PAD), lambda i: (0, 0)),    # W1 (full, bf16)
                pl.BlockSpec((1, HIDDEN_PAD), lambda i: (0, 0)),             # b1 (full, f32)
                pl.BlockSpec((HIDDEN_PAD, CLASSES_PAD), lambda i: (0, 0)),   # W2 (full, bf16)
                pl.BlockSpec((1, CLASSES_PAD), lambda i: (0, 0)),            # b2 (full, f32)
            ],
            out_specs=pl.BlockSpec((tile_b, CLASSES_PAD), lambda i: (i, 0)),
        ),
        compiler_params=pltpu.CompilerParams(
            dimension_semantics=("parallel",),       # shard batch grid across TCs (v7x)
            vmem_limit_bytes=32 * 1024 * 1024,       # plenty of headroom, even on v7x
        ),
    )(xp, w1p, b1p, w2p, b2p)

    # Slice off batch / class padding (reads bf16 now, half the traffic of f32).
    return out_padded[:B, :NUM_CLASSES]


def init_params(key):
    """Deterministic init mimicking nn.Linear default (U[-1/sqrt(fan_in), +1/sqrt(fan_in)]).
    Weights are stored as (in_features, out_features)."""
    k1, k2, k3, k4 = jax.random.split(key, 4)
    bound1 = 1.0 / jnp.sqrt(jnp.float32(INPUT_SIZE))
    bound2 = 1.0 / jnp.sqrt(jnp.float32(HIDDEN_SIZE))
    w1 = jax.random.uniform(k1, (INPUT_SIZE, HIDDEN_SIZE), jnp.float32,
                            minval=-bound1, maxval=bound1)
    b1 = jax.random.uniform(k2, (1, HIDDEN_SIZE), jnp.float32,
                            minval=-bound1, maxval=bound1)
    w2 = jax.random.uniform(k3, (HIDDEN_SIZE, NUM_CLASSES), jnp.float32,
                            minval=-bound2, maxval=bound2)
    b2 = jax.random.uniform(k4, (1, NUM_CLASSES), jnp.float32,
                            minval=-bound2, maxval=bound2)
    return w1, b1, w2, b2


if __name__ == "__main__":
    key = jax.random.PRNGKey(0)
    kx, kp = jax.random.split(key)

    B = 32  # small test batch; tile picker gives grid=(2,) here
    x = jax.random.normal(kx, (B, INPUT_SIZE), jnp.float32)
    w1, b1, w2, b2 = init_params(kp)

    # One-time parameter padding/casting (outside the hot path).
    w1p, b1p, w2p, b2p = prepare_params(w1, b1, w2, b2)
    w1p, b1p, w2p, b2p = jax.block_until_ready((w1p, b1p, w2p, b2p))

    out = feedforward(x, w1p, b1p, w2p, b2p)
    out = jax.block_until_ready(out)

    # Reference check in plain JAX (f32 math); tolerance loosened because the
    # kernel feeds bf16 operands to the MXU (f32 accumulation) and stores bf16
    # logits (fine for classification/argmax).
    ref = jnp.tanh(x @ w1 + b1) @ w2 + b2
    assert out.shape == (B, NUM_CLASSES)
    assert out.dtype == jnp.bfloat16
    err = jnp.max(jnp.abs(out.astype(jnp.float32) - ref))
    assert jnp.allclose(out.astype(jnp.float32), ref, atol=5e-2, rtol=5e-2), float(err)

    print("KERNEL_OK")
</pallas_src>

<mosaic_0001>
module attributes {stable_mosaic.version = 11 : i64} {
  func.func @_mlp_kernel(%arg0: i32, %arg1: memref<16x784xf32, #tpu.memory_space<vmem>>, %arg2: memref<784x128xbf16, #tpu.memory_space<vmem>>, %arg3: memref<1x128xf32, #tpu.memory_space<vmem>>, %arg4: memref<128x128xbf16, #tpu.memory_space<vmem>>, %arg5: memref<1x128xf32, #tpu.memory_space<vmem>>, %arg6: memref<16x128xbf16, #tpu.memory_space<vmem>>) attributes {dimension_semantics = [#tpu.dimension_semantics<parallel>], iteration_bounds = array<i64: 2>, scalar_prefetch = 0 : i64, scratch_operands = 0 : i64, tpu.core_type = #tpu.core_type<tc>, window_params = [{transform_indices = @transform_0, window_bounds = array<i64: 16, 784>}, {pipeline_mode = #tpu.pipeline_mode<synchronous>, transform_indices = @transform_1, window_bounds = array<i64: 784, 128>}, {pipeline_mode = #tpu.pipeline_mode<synchronous>, transform_indices = @transform_2, window_bounds = array<i64: 1, 128>}, {pipeline_mode = #tpu.pipeline_mode<synchronous>, transform_indices = @transform_3, window_bounds = array<i64: 128, 128>}, {pipeline_mode = #tpu.pipeline_mode<synchronous>, transform_indices = @transform_4, window_bounds = array<i64: 1, 128>}, {transform_indices = @transform_5, window_bounds = array<i64: 16, 128>}]} {
    %c0 = arith.constant 0 : index
    %c0_0 = arith.constant 0 : index
    %0 = vector.load %arg1[%c0, %c0_0] : memref<16x784xf32, #tpu.memory_space<vmem>>, vector<16x784xf32>
    %1 = arith.truncf %0 : vector<16x784xf32> to vector<16x784xbf16>
    %c0_1 = arith.constant 0 : index
    %c0_2 = arith.constant 0 : index
    %2 = vector.load %arg2[%c0_1, %c0_2] : memref<784x128xbf16, #tpu.memory_space<vmem>>, vector<784x128xbf16>
    %cst = arith.constant dense<0.000000e+00> : vector<16x128xf32>
    %3 = tpu.matmul %1, %2, %cst {dimension_numbers = #tpu.dot_dimension_numbers<[1], [0], [0], [1], [0, 0, 1, 1], [], []>} : vector<16x784xbf16>, vector<784x128xbf16>, vector<16x128xf32> -> vector<16x128xf32>
    %c0_3 = arith.constant 0 : index
    %c0_4 = arith.constant 0 : index
    %4 = vector.load %arg3[%c0_3, %c0_4] : memref<1x128xf32, #tpu.memory_space<vmem>>, vector<1x128xf32>
    %5 = vector.broadcast %4 : vector<1x128xf32> to vector<16x128xf32>
    %6 = arith.addf %3, %5 : vector<16x128xf32>
    %7 = math.tanh %6 : vector<16x128xf32>
    %8 = arith.truncf %7 : vector<16x128xf32> to vector<16x128xbf16>
    %c0_5 = arith.constant 0 : index
    %c0_6 = arith.constant 0 : index
    %9 = vector.load %arg4[%c0_5, %c0_6] : memref<128x128xbf16, #tpu.memory_space<vmem>>, vector<128x128xbf16>
    %cst_7 = arith.constant dense<0.000000e+00> : vector<16x128xf32>
    %10 = tpu.matmul %8, %9, %cst_7 {dimension_numbers = #tpu.dot_dimension_numbers<[1], [0], [0], [1], [0, 0, 1, 1], [], []>} : vector<16x128xbf16>, vector<128x128xbf16>, vector<16x128xf32> -> vector<16x128xf32>
    %c0_8 = arith.constant 0 : index
    %c0_9 = arith.constant 0 : index
    %11 = vector.load %arg5[%c0_8, %c0_9] : memref<1x128xf32, #tpu.memory_space<vmem>>, vector<1x128xf32>
    %12 = vector.broadcast %11 : vector<1x128xf32> to vector<16x128xf32>
    %13 = arith.addf %10, %12 : vector<16x128xf32>
    %14 = arith.truncf %13 : vector<16x128xf32> to vector<16x128xbf16>
    %c0_10 = arith.constant 0 : index
    %c0_11 = arith.constant 0 : index
    %15 = vector.load %arg6[%c0_10, %c0_11] : memref<16x128xbf16, #tpu.memory_space<vmem>>, vector<16x128xbf16>
    tpu.vector_store %arg6[%c0_10, %c0_11], %14 {strides = array<i32>} : memref<16x128xbf16, #tpu.memory_space<vmem>>, vector<16x128xbf16>,
    return
  }
  func.func @transform_0(%arg0: i32) -> (i32, i32) {
    %c0_i32 = arith.constant 0 : i32
    %c0_i32_0 = arith.constant 0 : i32
    return %arg0, %c0_i32 : i32, i32
  }
  func.func @transform_1(%arg0: i32) -> (i32, i32) {
    %c0_i32 = arith.constant 0 : i32
    %c0_i32_0 = arith.constant 0 : i32
    %c0_i32_1 = arith.constant 0 : i32
    return %c0_i32, %c0_i32_0 : i32, i32
  }
  func.func @transform_2(%arg0: i32) -> (i32, i32) {
    %c0_i32 = arith.constant 0 : i32
    %c0_i32_0 = arith.constant 0 : i32
    %c0_i32_1 = arith.constant 0 : i32
    return %c0_i32, %c0_i32_0 : i32, i32
  }
  func.func @transform_3(%arg0: i32) -> (i32, i32) {
    %c0_i32 = arith.constant 0 : i32
    %c0_i32_0 = arith.constant 0 : i32
    %c0_i32_1 = arith.constant 0 : i32
    return %c0_i32, %c0_i32_0 : i32, i32
  }
  func.func @transform_4(%arg0: i32) -> (i32, i32) {
    %c0_i32 = arith.constant 0 : i32
    %c0_i32_0 = arith.constant 0 : i32
    %c0_i32_1 = arith.constant 0 : i32
    return %c0_i32, %c0_i32_0 : i32, i32
  }
  func.func @transform_5(%arg0: i32) -> (i32, i32) {
    %c0_i32 = arith.constant 0 : i32
    %c0_i32_0 = arith.constant 0 : i32
    return %arg0, %c0_i32 : i32, i32
  }
}

</mosaic_0001>

<bundles_post_ra>
// kernel: tpu_custom_call.1
= control target key start
LH: loop header
LB: loop body
LE: loop exit
PB: predicated region body
PF: predicated region fallthrough
CT: control target
= control target key end

     0   :  { %10 = vsyncpa [#allocation3], 0  ;;  %s1894_s0 = inlined_call_operand.hbm [shape: f32[32,784], index: 0, kind: input, shape index: {}]   ;;  %s1895_s1 = inlined_call_operand.hbm [shape: bf16[784,128], index: 1, kind: input, shape index: {}]   ;;  %s1896_s2 = inlined_call_operand.vmem [shape: f32[1,128], index: 2, kind: input, shape index: {}]   ;;  %s1897_s3 = inlined_call_operand.hbm [shape: bf16[128,128], index: 3, kind: input, shape index: {}]   ;;  %s1898_s4 = inlined_call_operand.vmem [shape: f32[1,128], index: 4, kind: input, shape index: {}]   ;;  %s1899_s5 = inlined_call_operand.hbm [shape: bf16[32,128], index: 5, kind: output, shape index: {}]  }
   0x1   :  { %12 = vsyncpa [#allocation3 + $0x1], 0 }
   0x2   :  { %13 = vsyncpa [#allocation6], 0 }
   0x3   :  { %14 = vsyncpa [#allocation4], 0 }
   0x4   :  { %16 = vsyncpa [#allocation4 + $0x1], 0  ;;  %s1624_s18 = smov 0   ;;  %s1626_s19 = smov 0  }
   0x5   :  { %s1628_s20 = smov 0   ;;  %s1630_s21 = smov 0  }
   0x6 LB: > { %s1645_s22 = sadd.s32 4294967295, %s1580_s21   ;;  %s1095_s23 = sadd.s32 4294967294, %s1580_s21   ;;  %s1580_s21 = sphi %s1630_s21, %s1919_s21   ;;  %s1576_s20 = sphi %s1628_s20, %s1918_s20   ;;  %s1572_s19 = sphi %s1626_s19, %s1917_s19   ;;  %s1568_s18 = sphi %s1624_s18, %s1916_s18  }
   0x7   : > { %p42_p0 = scmp.ne.s32.totalorder %s1572_s19, %s1568_s18  ;;  %p1900_p1 = scmp.eq.s32.totalorder %s1645_s22, 0 }
   0x8   : > { %p156_p3 = scmp.eq.s32.totalorder %s1095_s23, 1  ;;  %p1096_p5 = scmp.ge.s32.totalorder %s1580_s21, 1 }
   0x9   : > { %p1654_p4 = por %p1900_p1, %p42_p0  ;;  %p163_p7 = scmp.lt.s32.totalorder %s1580_s21, 3 }
   0xa   : > { %p1659_p6 = por %p156_p3, %p42_p0  ;;  %s1582_s27 = smov [#allocation5]  }
   0xb   : > { %s1903_s24 = scalar_select %p1654_p4, 1, 0 }
   0xc   : > { %s1904_s25 = scalar_select %p1659_p6, 1, 0 }
   0xd   : > { %p1664_p8 = pnand %p1096_p5, %p163_p7  ;;  %s175_s28 = sshll.u32 %s1582_s27, 4  ;;  %s1668_s28 = int_to_ptr.vmem [resolvable:$true] %s175_s28 }
   0xe   : > { %s1583_s30 = smov [#allocation7]   ;;  %s1424_s9 = scalar_lea.hbm %s1895_s1, 6272 }
   0xf   : > { %p1300_p9 = pneg %p1664_p8  ;;  %s191_s6 = sshll.u32 %s1583_s30, 4  ;;  %s1679_s6 = int_to_ptr.vmem [resolvable:$true] %s191_s6 }
  0x10   : > { %p1425_p12 = scmp.ne.s32.totalorder %s1895_s1, %s1424_s9  ;;  %p1431_p5 = scmp.lt.u32.totalorder %s1424_s9, %s1895_s1 }
  0x11   : > { %p1675_p11 = pnand %p1300_p9, %p1900_p1 }
  0x13   : > { %p1426_p13 = pneg %p1675_p11 }
  0x15   : > { %p1427_p0 = pnand %p1426_p13, %p1425_p12 }
  0x17   : > { %p1428_p3 = pneg %p1427_p0 }
  0x19   : > { %p1433_p7 = pnand %p1431_p5, %p1428_p3 }
  0x1b   : > { %1436 = shalt.err (!%p1433_p7)
}
  0x1c   : > { %s1437_s14 = scalar_lea.vmem %s1668_s28, 6272  ;;  %p1445_p2 = scmp.lt.s32.totalorder %s1668_s28, %s1668_s28 }
  0x1d   : > { %p1438_p9 = scmp.ne.s32.totalorder %s1668_s28, %s1437_s14  ;;  %p1446_p12 = scmp.lt.s32.totalorder %s1437_s14, %s1437_s14 }
  0x1f   : > { %p1440_p10 = pnand %p1438_p9, %p1426_p13  ;;  %p1447_p0 = por %p1446_p12, %p1445_p2 }
  0x21   : > { %p1441_p1 = pneg %p1440_p10 }
  0x23   : > { %p1448_p6 = pnand %p1447_p0, %p1441_p1 }
  0x25   : > { %1451 = shalt.err (!%p1448_p6)
}
  0x26   : > { %s1584_s15 = smov 64   ;;  %s1585_s16 = smov 4  }
  0x27   : > { %1303 = dma.hbm_to_vmem [thread:$0]  (!%p1675_p11), %s1895_s1, 6272, %s1668_s28, [#allocation6], %s1584_s15, %s1584_s15, %s1585_s16  }
  0x28   : > { %s1452_s7 = scalar_lea.hbm %s1897_s3, 1024 }
  0x29   : > { %p1453_p2 = scmp.ne.s32.totalorder %s1897_s3, %s1452_s7  ;;  %p1459_p10 = scmp.lt.u32.totalorder %s1452_s7, %s1897_s3 }
  0x2b   : > { %p1455_p1 = pnand %p1453_p2, %p1426_p13 }
  0x2d   : > { %p1456_p6 = pneg %p1455_p1 }
  0x2f   : > { %p1461_p3 = pnand %p1459_p10, %p1456_p6 }
  0x31   : > { %1464 = shalt.err (!%p1461_p3)
}
  0x32   : > { %s1465_s28 = scalar_lea.vmem %s1679_s6, 1024  ;;  %p1473_p12 = scmp.lt.s32.totalorder %s1679_s6, %s1679_s6 }
  0x33   : > { %p1466_p5 = scmp.ne.s32.totalorder %s1679_s6, %s1465_s28  ;;  %p1474_p0 = scmp.lt.s32.totalorder %s1465_s28, %s1465_s28 }
  0x35   : > { %p1468_p7 = pnand %p1466_p5, %p1426_p13  ;;  %p1475_p2 = por %p1474_p0, %p1473_p12 }
  0x37   : > { %p1469_p9 = pneg %p1468_p7 }
  0x39   : > { %p1476_p1 = pnand %p1475_p2, %p1469_p9 }
  0x3b   : > { %1479 = shalt.err (!%p1476_p1)
}
  0x3c   : > { %1306 = dma.hbm_to_vmem [thread:$0]  (!%p1675_p11), %s1897_s3, 1024, %s1679_s6, [#allocation6], %s1584_s15, %s1584_s15, %s1585_s16  }
  0x3d   : > { %s1734_s14 = sadd.s32 1, %s1580_s21   ;;  %s29_s29 = sadd.s32 1, %s1576_s20 }
  0x3e   : > { %s26_s17 = ssub.s32 %s1580_s21, %s1734_s14  ;;  %p36_p13 = scmp.ne.s32.totalorder %s1576_s20, %s1572_s19 }
  0x3f   : > { %p27_p6 = scmp.eq.s32.totalorder %s26_s17, 0  ;;  %p37_p10 = scmp.eq.s32.totalorder %s1580_s21, 0 }
  0x40   : > { %p1907_p3 = scmp.eq.s32.totalorder %s1645_s22, 1  ;;  %p1317_p7 = scmp.lt.s32.totalorder %s1580_s21, 2 }
  0x41   : > { %s1750_s27 = scalar_select %p27_p6, %s1576_s20, %s29_s29  }
  0x42   : > { %p1744_p5 = por %p1907_p3, %p36_p13  ;;  %p38_p9 = por %p37_p10, %p36_p13 }
  0x43   : > { %s208_s30 = sand.u32 1, %s1576_s20   ;;  %s1286_s6 = smul.u32 1792, %s1580_s21 }
  0x44   : > { %s1908_s23 = scalar_select %p1744_p5, 1, 0 }
  0x45   : > { %s1285_s7 = smul.u32 112, %s208_s30  ;;  %p1754_p11 = pnand %p1317_p7, %p38_p9 }
  0x46   : > { %s1761_s9 = scalar_lea.hbm %s1894_s0, %s1286_s6  ;;  %s1765_s28 = scalar_lea.sflag [#allocation3], %s208_s30 }
  0x47   : > { %s212_s10 = scalar_lea.vmem [#allocation2], %s1285_s7  ;;  %s1480_s12 = scalar_lea.hbm %s1761_s9, 1792 }
  0x48   : > { %s220_s11 = sshll.u32 %s212_s10, 4  ;;  %p1481_p12 = scmp.ne.s32.totalorder %s1761_s9, %s1480_s12  ;;  %s1763_s11 = int_to_ptr.vmem [resolvable:$true] %s220_s11 }
  0x49   : > { %p1482_p0 = pneg %p1754_p11  ;;  %s1485_s17 = scalar_lea.hbm %s1894_s0, 3584 }
  0x4a   : > { %p1486_p13 = scmp.lt.u32.totalorder %s1761_s9, %s1894_s0  ;;  %p1487_p6 = scmp.lt.u32.totalorder %s1485_s17, %s1480_s12 }
  0x4b   : > { %p1483_p2 = pnand %p1482_p0, %p1481_p12  ;;  %p1489_p3 = scmp.lt.u32.totalorder %s1480_s12, %s1761_s9 }
  0x4c   : > { %p1488_p10 = por %p1487_p6, %p1486_p13 }
  0x4d   : > { %p1484_p1 = pneg %p1483_p2 }
  0x4e   : > { %p1490_p7 = por %p1489_p3, %p1488_p10 }
  0x50   : > { %p1491_p9 = pnand %p1490_p7, %p1484_p1 }
  0x52   : > { %1494 = shalt.err (!%p1491_p9)
}
  0x53   : > { %s1495_s30 = scalar_lea.vmem %s1763_s11, 1792  ;;  %s1586_s7 = smov [#allocation2]  }
  0x54   : > { %p1496_p12 = scmp.ne.s32.totalorder %s1763_s11, %s1495_s30  ;;  %s1500_s8 = sshll.u32 %s1586_s7, 4  ;;  %s1501_s8 = int_to_ptr.vmem [resolvable:$false] %s1500_s8 }
  0x55   : > { %s1502_s10 = scalar_lea.vmem %s1501_s8, 3584  ;;  %p1503_p4 = scmp.lt.s32.totalorder %s1763_s11, %s1501_s8 }
  0x56   : > { %p1498_p2 = pnand %p1496_p12, %p1482_p0  ;;  %p1504_p13 = scmp.lt.s32.totalorder %s1502_s10, %s1495_s30 }
  0x58   : > { %p1499_p5 = pneg %p1498_p2  ;;  %p1505_p6 = por %p1504_p13, %p1503_p4 }
  0x5a   : > { %p1506_p10 = pnand %p1505_p6, %p1499_p5 }
  0x5c   : > { %1509 = shalt.err (!%p1506_p10)
}
  0x5d   : > { %s1587_s12 = smov 896   ;;  %s1588_s13 = smov 56  }
  0x5e   : > { %1310 = dma.hbm_to_vmem [thread:$0]  (!%p1754_p11), %s1761_s9, 1792, %s1763_s11, %s1765_s28, %s1587_s12, %s1587_s12, %s1588_s13  }
  0x5f   : > { %232 = sbr.rel (%p1664_p8) target bundleno = 638 (0x27e), region = 40  ;;  %s1796_s29 = sand.u32 (!%p1664_p8), 1, %s1572_s19  }
  0x60   : > { %s1287_s17 = smul.u32 (!%p1664_p8), 112, %s1796_s29  ;;  %s235_s6 = scalar_lea.sflag (!%p1664_p8), [#allocation3], %s1796_s29 }
  0x61   : > { %p1910_p4 = scmp.ne.s32.totalorder (!%p1664_p8), %s1903_s24, 0 }
  0x62   : > { %s1800_s16 = scalar_lea.vmem (!%p1664_p8), [#allocation2], %s1287_s17 }
  0x66   : > { %1555 = dma.done.wait (%p1910_p4), %s235_s6, 1792  }
  0x67   : > { %1557 = vsyncadd (%p1910_p4), %s235_s6, 4294965504  ;;  %p1911_p5 = scmp.eq.s32.totalorder %s1645_s22, 0 }
  0x69   : > { %1559 = dma.done.wait (%p1911_p5), [#allocation6], 7296   ;;  %p1912_p8 = pmov %p1911_p5 }
  0x6a   : > { %v1363_v0 = vld [vmem:[#allocation5 + $0x40] sm:$0xff]   ;;  %v1367_v4 = vld [vmem:[#allocation5 + $0x48] sm:$0xff]   ;;  %v1371_v8 = vld [vmem:[#allocation5 + $0x50] sm:$0xff]   ;;  %v1589_v43 = vmov 0.0   ;;  %vm1590_vm0 = vmmov 0   ;;  %vm696_vm1 = vcmask 130048  }
  0x6b   : > { %1561 = vsyncadd (%p1912_p8), [#allocation6], 4294960000  ;;  %v1364_v1 = vld [vmem:[#allocation5] sm:$0xff]   ;;  %1182 = vmatprep.subr.bf16.mxu0 %v1363_v0  ;;  %v1368_v5 = vld [vmem:[#allocation5 + $0x8] sm:$0xff]   ;;  %s1106_s15 = sshll.u32 %s1796_s29, 3  ;;  %s1176_s7 = sshll.u32 %s1645_s22, 7 }
  0x6c   : > { %v1365_v2 = vld [vmem:[#allocation5 + $0xc0] sm:$0xff]   ;;  %1183 = vmatpush3.bf16.msra.mxu0 %v1364_v1  ;;  %v1369_v6 = vld [vmem:[#allocation5 + $0xc8] sm:$0xff]   ;;  %v1372_v9 = vld [vmem:[#allocation5 + $0x10] sm:$0xff]   ;;  %s272_s28 = scalar_lea.vmem [#allocation8], %s1106_s15  ;;  %s1850_s12 = scalar_lea.hbm %s1899_s5, %s1176_s7 }
  0x6d   : > { %v1366_v3 = vld [vmem:[#allocation5 + $0x80] sm:$0xff]   ;;  %1204 = vmatprep.subr.bf16.mxu1 %v1365_v2  ;;  %1184 = vmatprep.subr.bf16.mxu0 %v1367_v4  ;;  %v1370_v7 = vld [vmem:[#allocation5 + $0x88] sm:$0xff]   ;;  %v1373_v10 = vld [vmem:[#allocation5 + $0xd0] sm:$0xff]   ;;  %s1003_s30 = sshll.u32 %s272_s28, 4  ;;  %s990_s13 = scalar_lea.sflag [#allocation4], %s1796_s29  ;;  %s1845_s30 = int_to_ptr.vmem [resolvable:$true] %s1003_s30 }
  0x6e   : > { %1205 = vmatpush3.bf16.msra.mxu1 %v1366_v3  ;;  %v1374_v11 = vld [vmem:[#allocation5 + $0x90] sm:$0xff]   ;;  %v1375_v12 = vld [vmem:[#allocation5 + $0x58] sm:$0xff]   ;;  %v1379_v16 = vld [vmem:[#allocation5 + $0x60] sm:$0xff]   ;;  %s1510_s17 = scalar_lea.vmem %s1845_s30, 128  ;;  %p1913_p0 = scmp.ne.s32.totalorder %s1908_s23, 0 }
  0x6f   : > { %1206 = vmatprep.subr.bf16.mxu1 %v1369_v6  ;;  %v1376_v13 = vld [vmem:[#allocation5 + $0x18] sm:$0xff]   ;;  %v1380_v17 = vld [vmem:[#allocation5 + $0x20] sm:$0xff]   ;;  %v1383_v20 = vld [vmem:[#allocation5 + $0x68] sm:$0xff]   ;;  %p1511_p11 = scmp.ne.s32.totalorder %s1845_s30, %s1510_s17  ;;  %s1591_s22 = smov [#allocation8]  }
  0x70   : > { %1185 = vmatpush3.bf16.msra.mxu0 %v1368_v5  ;;  %v1377_v14 = vld [vmem:[#allocation5 + $0xd8] sm:$0xff]   ;;  %v1381_v18 = vld [vmem:[#allocation5 + $0xe0] sm:$0xff]   ;;  %v1384_v21 = vld [vmem:[#allocation5 + $0x28] sm:$0xff]   ;;  %s1514_s6 = sshll.u32 %s1591_s22, 4  ;;  %s1515_s6 = int_to_ptr.vmem [resolvable:$false] %s1514_s6 }
  0x71   : > { %1186 = vmatprep.subr.bf16.mxu0 %v1371_v8  ;;  %v1378_v15 = vld [vmem:[#allocation5 + $0x98] sm:$0xff]   ;;  %v1382_v19 = vld [vmem:[#allocation5 + $0xa0] sm:$0xff]   ;;  %v1385_v22 = vld [vmem:[#allocation5 + $0xe8] sm:$0xff]   ;;  %p1512_p1 = pnand %p1511_p11, %p1913_p0  ;;  %p1517_p7 = scmp.lt.s32.totalorder %s1845_s30, %s1515_s6 }
  0x72   : > { %1207 = vmatpush3.bf16.msra.mxu1 %v1370_v7  ;;  %v1386_v23 = vld [vmem:[#allocation5 + $0xa8] sm:$0xff]   ;;  %v1387_v24 = vld [vmem:[#allocation5 + $0x70] sm:$0xff]   ;;  %v1391_v28 = vld [vmem:[#allocation5 + $0x78] sm:$0xff]  }
  0x73   : > { %1208 = vmatprep.subr.bf16.mxu1 %v1373_v10  ;;  %v1388_v25 = vld [vmem:[#allocation5 + $0x30] sm:$0xff]   ;;  %v1392_v29 = vld [vmem:[#allocation5 + $0x38] sm:$0xff]   ;;  %v1395_v38 = vld [vmem:[#allocation5 + $0x140] sm:$0xff]   ;;  %p1513_p3 = pneg %p1512_p1 }
  0x74   : > { %1187 = vmatpush3.bf16.msra.mxu0 %v1372_v9  ;;  %v1389_v26 = vld [vmem:[#allocation5 + $0xf0] sm:$0xff]   ;;  %v1393_v30 = vld [vmem:[#allocation5 + $0xf8] sm:$0xff]   ;;  %v1396_v42 = vld [vmem:[#allocation5 + $0x100] sm:$0xff]  }
  0x75   : > { %1188 = vmatprep.subr.bf16.mxu0 %v1375_v12  ;;  %v1390_v27 = vld [vmem:[#allocation5 + $0xb0] sm:$0xff]   ;;  %v277_v31 = vld [vmem:[%s1800_s16 + $0x8] sm:$0xff]  ;;  %v283_v36 = vld [vmem:[%s1800_s16 + $0x38] sm:$0xff] }
  0x76   : > { %1209 = vmatpush3.bf16.msra.mxu1 %v1374_v11  ;;  %v284_v32 = vld [vmem:[%s1800_s16 + $0x40] sm:$0xff]  ;;  %v1394_v34 = vld [vmem:[#allocation5 + $0xb8] sm:$0xff]   ;;  %v286_v40 = vld [vmem:[%s1800_s16 + $0x50] sm:$0xff] }
  0x77   : > { %1210 = vmatprep.subr.bf16.mxu1 %v1377_v14  ;;  %v291_v33 = vpack.c.bf16 %v284_v32, %v277_v31  ;;  %v276_v35 = vld [vmem:[%s1800_s16] sm:$0xff]  ;;  %v279_v39 = vld [vmem:[%s1800_s16 + $0x18] sm:$0xff]  ;;  %v278_v44 = vld [vmem:[%s1800_s16 + $0x10] sm:$0xff] }
  0x78   : > { %1189 = vmatpush3.bf16.msra.mxu0 %v1376_v13  ;;  %v290_v37 = vpack.c.bf16 %v283_v36, %v276_v35  ;;  %v293_v41 = vpack.c.bf16 %v286_v40, %v279_v39  ;;  %v285_v45 = vld [vmem:[%s1800_s16 + $0x48] sm:$0xff]  ;;  %v1399_v49 = vld [vmem:[#allocation5 + $0x150] sm:$0xff]   ;;  %v1403_v53 = vld [vmem:[#allocation5 + $0x160] sm:$0xff]  }
  0x79   : > { %1190 = vmatprep.subr.bf16.mxu0 %v1379_v16  ;;  %732 = vmatprep.mubr.bf16.mxu0 %v291_v33  ;;  %v292_v46 = vpack.c.bf16 %v285_v45, %v278_v44  ;;  %v1397_v47 = vld [vmem:[#allocation5 + $0x148] sm:$0xff]   ;;  %v1400_v50 = vld [vmem:[#allocation5 + $0x110] sm:$0xff]   ;;  %v1401_v51 = vld [vmem:[#allocation5 + $0x158] sm:$0xff]  }
  0x7a   : > { %1211 = vmatpush3.bf16.msra.mxu1 %v1378_v15  ;;  %773 = vmatprep.mubr.bf16.mxu1 %v293_v41  ;;  %v1398_v48 = vld [vmem:[#allocation5 + $0x108] sm:$0xff]   ;;  %v1402_v52 = vld [vmem:[#allocation5 + $0x118] sm:$0xff]   ;;  %v1404_v54 = vld [vmem:[#allocation5 + $0x120] sm:$0xff]  }
  0x7b   : > { %1212 = vmatprep.subr.bf16.mxu1 %v1381_v18  ;;  %v1405_v55 = vld [vmem:[#allocation5 + $0x168] sm:$0xff]   ;;  %v1411_v56 = vld [vmem:[#allocation5 + $0x180] sm:$0xff]   ;;  %v1407_v59 = vld [vmem:[#allocation5 + $0x170] sm:$0xff]  }
  0x7c   : > { %1191 = vmatpush3.bf16.msra.mxu0 %v1380_v17  ;;  %v281_v57 = vld [vmem:[%s1800_s16 + $0x28] sm:$0xff]  ;;  %v288_v60 = vld [vmem:[%s1800_s16 + $0x60] sm:$0xff]  ;;  %v282_v62 = vld [vmem:[%s1800_s16 + $0x30] sm:$0xff] }
  0x7d   : > { %1192 = vmatprep.subr.bf16.mxu0 %v1383_v20  ;;  %v1406_v58 = vld [vmem:[#allocation5 + $0x128] sm:$0xff]   ;;  %v295_v61 = vpack.c.bf16 %v288_v60, %v281_v57  ;;  %v1408_v1 = vld [vmem:[#allocation5 + $0x130] sm:$0xff]   ;;  %v1409_v2 = vld [vmem:[#allocation5 + $0x178] sm:$0xff]  }
  0x7e   : > { %1213 = vmatpush3.bf16.msra.mxu1 %v1382_v19  ;;  %v289_v63 = vld [vmem:[%s1800_s16 + $0x68] sm:$0xff]  ;;  %v280_v4 = vld [vmem:[%s1800_s16 + $0x20] sm:$0xff]  ;;  %v287_v5 = vld [vmem:[%s1800_s16 + $0x58] sm:$0xff]  ;;  %s1516_s16 = scalar_lea.vmem %s1515_s6, 256 }
  0x7f   : > { %1214 = vmatprep.subr.bf16.mxu1 %v1385_v22  ;;  %v296_v0 = vpack.c.bf16 %v289_v63, %v282_v62  ;;  %v1410_v3 = vld [vmem:[#allocation5 + $0x138] sm:$0xff]   ;;  %v294_v6 = vpack.c.bf16 %v287_v5, %v280_v4  ;;  %v1412_v7 = vld [vmem:[#allocation7] sm:$0xff]   ;;  %v1413_v8 = vld [vmem:[#allocation7 + $0x8] sm:$0xff]   ;;  %p1518_p9 = scmp.lt.s32.totalorder %s1516_s16, %s1510_s17 }
  0x80   : > { %1193 = vmatpush3.bf16.msra.mxu0 %v1384_v21  ;;  %v1414_v9 = vld [vmem:[#allocation7 + $0x10] sm:$0xff]   ;;  %v1415_v10 = vld [vmem:[#allocation7 + $0x18] sm:$0xff]   ;;  %v1416_v11 = vld [vmem:[#allocation7 + $0x20] sm:$0xff]  }
  0x81   : > { %1194 = vmatprep.subr.bf16.mxu0 %v1387_v24  ;;  %v1417_v12 = vld [vmem:[#allocation7 + $0x28] sm:$0xff]   ;;  %v1418_v13 = vld [vmem:[#allocation7 + $0x30] sm:$0xff]   ;;  %v1419_v14 = vld [vmem:[#allocation7 + $0x38] sm:$0xff]   ;;  %p1519_p12 = por %p1518_p9, %p1517_p7 }
  0x82   : > { %1215 = vmatpush3.bf16.msra.mxu1 %v1386_v23  ;;  %v1107_v16 = vld [vmem:[%s1896_s2] ss:$0 sm:$0xff] }
  0x83   : > { %1216 = vmatprep.subr.bf16.mxu1 %v1389_v26  ;;  %p1520_p2 = pnand %p1519_p12, %p1513_p3 }
  0x84   : > { %1195 = vmatpush3.bf16.msra.mxu0 %v1388_v25 }
  0x85   : > { %1196 = vmatprep.subr.bf16.mxu0 %v1391_v28 }
  0x86   : > { %1217 = vmatpush3.bf16.msra.mxu1 %v1390_v27 }
  0x87   : > { %1218 = vmatprep.subr.bf16.mxu1 %v1393_v30 }
  0x88   : > { %1197 = vmatpush3.bf16.msra.mxu0 %v1392_v29 }
  0x89   : > { %1226 = vmatprep.subr.bf16.mxu0 %v1395_v38 }
  0x8a   : > { %1219 = vmatpush3.bf16.msra.mxu1 %v1394_v34 }
  0x8b   : > { %1259 = vmatprep.subr.bf16.mxu1 %v1589_v43  ;;  %733 = vmatmul.mubr.bf16.vlgmr.msra.gmra.mrb[0].mxu0 %v290_v37 }
  0x8c   : > { %1227 = vmatpush3.bf16.msra.mxu0 %v1396_v42  ;;  %814 = vmatprep.mubr.bf16.mxu0 %v295_v61 }
  0x8d   : > { %774 = vmatmul.mubr.bf16.vlgmr.msra.gmra.mrb[0].mxu1 %v292_v46  ;;  %1228 = vmatprep.subr.bf16.mxu0 %v1397_v47 }
  0x8e   : > { %1261 = vmatprep.mubr.msk.bf16.mxu1 %vm1590_vm0, %v1589_v43  ;;  %1260 = vmatpush3.bf16.msra.mxu1 %v1411_v56 }
  0x8f   : > { %1265 = vmatprep.subr.bf16.mxu1 %v1589_v43 }
  0x90   : > { %1229 = vmatpush3.bf16.msra.mxu0 %v1398_v48 }
  0x91   : > { %1230 = vmatprep.subr.bf16.mxu0 %v1399_v49  ;;  %v1158_v49 = vld [vmem:[%s1898_s4] ss:$0 sm:$0xff] }
  0x94   : > { %1231 = vmatpush3.bf16.msra.mxu0 %v1400_v50 }
  0x95   : > { %1232 = vmatprep.subr.bf16.mxu0 %v1401_v51  ;;  %1262 = vmatmul.mubr.msk.bf16.vlgmr.msra.gmra.mrb[4].mxu1 %vm696_vm1, %v296_v0 }
  0x96   : > { %1281 = vmatprep.mubr.msk.bf16.mxu1 %vm1590_vm0, %v1589_v43  ;;  %1266 = vmatpush3.bf16.msra.mxu1 %v1412_v7 }
  0x97   : > { %1267 = vmatprep.subr.bf16.mxu1 %v1589_v43 }
  0x98   : > { %1233 = vmatpush3.bf16.msra.mxu0 %v1402_v52 }
  0x99   : > { %1234 = vmatprep.subr.bf16.mxu0 %v1403_v53 }
  0x9a   : > { %1268 = vmatpush3.bf16.msra.mxu1 %v1413_v8 }
  0x9b   : > { %1269 = vmatprep.subr.bf16.mxu1 %v1589_v43 }
  0x9c   : > { %1235 = vmatpush3.bf16.msra.mxu0 %v1404_v54 }
  0x9d   : > { %1236 = vmatprep.subr.bf16.mxu0 %v1405_v55 }
  0x9e   : > { %1270 = vmatpush3.bf16.msra.mxu1 %v1414_v9 }
  0x9f   : > { %1271 = vmatprep.subr.bf16.mxu1 %v1589_v43 }
  0xa0   : > { %1237 = vmatpush3.bf16.msra.mxu0 %v1406_v58 }
  0xa1   : > { %1238 = vmatprep.subr.bf16.mxu0 %v1407_v59 }
  0xa2   : > { %1272 = vmatpush3.bf16.msra.mxu1 %v1415_v10 }
  0xa3   : > { %1273 = vmatprep.subr.bf16.mxu1 %v1589_v43 }
  0xa4   : > { %1239 = vmatpush3.bf16.msra.mxu0 %v1408_v1 }
  0xa5   : > { %1240 = vmatprep.subr.bf16.mxu0 %v1409_v2 }
  0xa6   : > { %1274 = vmatpush3.bf16.msra.mxu1 %v1416_v11 }
  0xa7   : > { %1275 = vmatprep.subr.bf16.mxu1 %v1589_v43 }
  0xa8   : > { %1241 = vmatpush3.bf16.msra.mxu0 %v1410_v3 }
  0xaa   : > { %1276 = vmatpush3.bf16.msra.mxu1 %v1417_v12 }
  0xab   : > { %815 = vmatmul.mubr.bf16.vlgmr.msra.gmra.mrb[4].mxu0 %v294_v6  ;;  %1277 = vmatprep.subr.bf16.mxu1 %v1589_v43 }
  0xae   : > { %1278 = vmatpush3.bf16.msra.mxu1 %v1418_v13 }
  0xaf   : > { %1279 = vmatprep.subr.bf16.mxu1 %v1589_v43 }
  0xb2   : > { %1280 = vmatpush3.bf16.msra.mxu1 %v1419_v14 }
 0x15e   : > { %v1198_v15 = vpop.f32.mrb[0].mxu0 }
 0x15f   : > { %v1199_v17 = vpop.f32.mrb[1].mxu0 }
 0x160   : > { %v1200_v18 = vadd.f32 %v1199_v17, %v1198_v15  ;;  %v1201_v19 = vpop.f32.mrb[2].mxu0  ;;  %v1220_v20 = vpop.f32.mrb[0].mxu1 }
 0x161   : > { %v1202_v21 = vpop.f32.mrb[3].mxu0  ;;  %v1221_v24 = vpop.f32.mrb[1].mxu1 }
 0x162   : > { %v735_v22 = vadd.f32 %v1200_v18, %v1107_v16  ;;  %v1203_v23 = vadd.f32 %v1202_v21, %v1201_v19  ;;  %v1222_v25 = vadd.f32 %v1221_v24, %v1220_v20  ;;  %v1223_v26 = vpop.f32.mrb[2].mxu1 }
 0x163   : > { %v1224_v28 = vpop.f32.mrb[3].mxu1 }
 0x164   : > { %v738_v27 = vadd.f32 %v1203_v23, %v1107_v16  ;;  %v776_v29 = vadd.f32 %v1222_v25, %v735_v22  ;;  %v1225_v30 = vadd.f32 %v1224_v28, %v1223_v26 }
 0x166   : > { %v779_v31 = vadd.f32 %v1225_v30, %v738_v27 }
 0x168   : > { %v857_v32 = vpop.f32.mrb[4].mxu1 }
 0x169   : > { %v1263_v33 = vpop.f32.mrb[5].mxu1 }
 0x16a   : > { %v860_v34 = vpop.f32.mrb[6].mxu1 }
 0x16b   : > { %v1264_v35 = vpop.f32.mrb[7].mxu1 }
 0x17e   : > { %v1242_v36 = vpop.f32.mrb[4].mxu0 }
 0x17f   : > { %v1243_v37 = vpop.f32.mrb[5].mxu0 }
 0x180   : > { %v1244_v38 = vadd.f32 %v1243_v37, %v1242_v36  ;;  %v1245_v39 = vpop.f32.mrb[6].mxu0 }
 0x181   : > { %v1246_v40 = vpop.f32.mrb[7].mxu0 }
 0x182   : > { %v817_v41 = vadd.f32 %v1244_v38, %v776_v29  ;;  %v1247_v42 = vadd.f32 %v1246_v40, %v1245_v39 }
 0x184   : > { %v858_v43 = vadd.f32 %v857_v32, %v817_v41  ;;  %v820_v44 = vadd.f32 %v1247_v42, %v779_v31 }
 0x186   : > { %v861_v45 = vadd.f32 %v860_v34, %v820_v44  ;;  %1420 = vtanh.f32 %v858_v43 }
 0x188   : > { %1422 = vtanh.f32 %v861_v45 }
 0x190   : > { %v1421_v46 = vpop.eup %1420 }
 0x192   : > { %v1423_v47 = vpop.eup %1422 }
 0x193   : > { %v866_v48 = vpack.c.bf16 %v1423_v47, %v1421_v46 }
 0x195   : > { %1282 = vmatmul.mubr.bf16.vlgmr.msra.gmra.mrb[8].mxu1 %v866_v48 }
 0x268   : > { %v972_v50 = vpop.f32.mrb[8].mxu1 }
 0x269   : > { %v1283_v51 = vpop.f32.mrb[9].mxu1  ;;  %v973_v53 = vadd.f32 %v1158_v49, %v972_v50 }
 0x26a   : > { %v975_v52 = vpop.f32.mrb[10].mxu1 }
 0x26b   : > { %v976_v54 = vadd.f32 %v1158_v49, %v975_v52  ;;  %v1284_v55 = vpop.f32.mrb[11].mxu1 }
 0x26d   : > { %v1180_v56 = vpack.c.bf16 %v976_v54, %v973_v53 }
 0x26f   : > { %1181 = vst [vmem:[%s272_s28] sm:$0xff] %v1180_v56  }
 0x270   : > { %1523 = shalt.err (!%p1520_p2)
}
 0x271   : > { %s1524_s24 = scalar_lea.hbm %s1850_s12, 128  ;;  %s1528_s9 = scalar_lea.hbm %s1899_s5, 256 }
 0x272   : > { %p1525_p13 = scmp.ne.s32.totalorder %s1850_s12, %s1524_s24  ;;  %p1529_p4 = scmp.lt.u32.totalorder %s1850_s12, %s1899_s5 }
 0x273   : > { %p1530_p5 = scmp.lt.u32.totalorder %s1528_s9, %s1524_s24  ;;  %p1532_p11 = scmp.lt.u32.totalorder %s1524_s24, %s1850_s12 }
 0x274   : > { %p1526_p6 = pnand %p1525_p13, %p1913_p0 }
 0x275   : > { %p1531_p8 = por %p1530_p5, %p1529_p4 }
 0x276   : > { %p1527_p10 = pneg %p1526_p6 }
 0x277   : > { %p1533_p1 = por %p1532_p11, %p1531_p8 }
 0x279   : > { %p1534_p3 = pnand %p1533_p1, %p1527_p10 }
 0x27b   : > { %1537 = shalt.err (!%p1534_p3)
}
 0x27c   : > { %s1592_s7 = smov 64   ;;  %s1593_s8 = smov 4  }
 0x27d   : > { %1298 = dma.vmem_to_hbm [thread:$0]  (%p1913_p0), %s1845_s30, 128, %s1850_s12, %s990_s13, %s1592_s7, %s1592_s7, %s1593_s8  }
 0x27e PF: > { %s1018_s10 = sand.u32 1, %s1568_s18   ;;  %p1914_p7 = scmp.ne.s32.totalorder %s1904_s25, 0 }
 0x27f   : > { %p1915_p9 = scmp.ge.s32.totalorder %s1580_s21, 2  ;;  %s1019_s17 = scalar_lea.sflag [#allocation4], %s1018_s10 }
 0x281   : > { %p1312_p12 = pnand %p1915_p9, %p1914_p7 }
 0x283   : > { %1563 = dma.done.wait (!%p1312_p12), %s1019_s17, 128  }
 0x284   : > { %1565 = vsyncadd (!%p1312_p12), %s1019_s17, 4294967168  ;;  %p19_p2 = scmp.ge.s32.totalorder %s1734_s14, 4   ;;  %s1916_s18 = smov %s1572_s19 }
 0x285   : > { %s1917_s19 = smov %s1576_s20  ;;  %s1918_s20 = smov %s1750_s27 }
 0x286   : > { %s1919_s21 = smov %s1734_s14  ;;  %21 = sbr.rel (!%p19_p2) target bundleno = 6 (0x6), region = 93 }
 0x28d   :  { %1024 = vsyncpa [#allocation3], 1 }
 0x28e   :  { %1026 = vsyncpa [#allocation3 + $0x1], 1 }
 0x28f   :  { %1027 = vsyncpa [#allocation6], 1 }
 0x290   :  { %1028 = vsyncpa [#allocation4], 1 }
 0x291   :  { %1030 = vsyncpa [#allocation4 + $0x1], 1 }

</bundles_post_ra>
